<compile_context>
chip_gen: v5e
topology: v5e:2x2
jax: 0.10.0
libtpu: 0.0.40
codegen_flags: <defaults>
</compile_context>

<pallas_src>
import functools

import jax
import jax.numpy as jnp
from jax import lax
from jax.experimental import pallas as pl
from jax.experimental.pallas import tpu as pltpu

# ---- module "constants" (module-level in the original file) ----------------
WINDOW = 5
EMBEDDING_SIZE = 32
DROPOUT = 0.5                       # eval-mode forward => identity
VOCAB = 100                         # count_distinct_words
HIDDEN = 64
NUM_TAGS = 8
NETWORK_STRUCTURE = (WINDOW * EMBEDDING_SIZE, HIDDEN, NUM_TAGS)

K_FUSED = WINDOW * VOCAB            # 500  (fused one-hot contraction dim)
K_PAD = 512                         # padded to a multiple of 256 for the MXU
HID_PAD = 128                       # lane-dense hidden width
OUT_PAD = 128                       # lane-dense output width
NEG_BIG = -1e30                     # padded logit bias -> exp() underflows to 0


def _round_up(x, m):
    return (x + m - 1) // m * m


def _tagger_kernel(offs_ref, fused_ref, b1_ref, w2_ref, b2_ref, out_ref):
    """One batch tile: multi-hot @ fused_table -> tanh -> W2 -> softmax."""
    offs = offs_ref[...]                               # [tile_n, WINDOW] int32
    k = fused_ref.shape[0]                             # K_PAD

    # Lane-only iota; broadcasting happens inside the compare so no full-tile
    # int32 iota temporary is materialized.
    lane = lax.broadcasted_iota(jnp.int32, (1, k), 1)

    # Boolean multi-hot over the fused (window-offset) vocabulary. Window
    # offsets land in disjoint 100-wide blocks, so OR-combining the per-window
    # one-hots equals their sum. Single narrowing convert to bf16 at the end
    # (0/1 exact in bf16); compares/ORs stay in mask arithmetic (v5e-safe).
    mask = lane == offs[:, 0][:, None]
    for w in range(1, WINDOW):
        mask = jnp.logical_or(mask, lane == offs[:, w][:, None])
    hot = mask.astype(jnp.bfloat16)                    # [tile_n, K_PAD] bf16

    # --- Dropout: eval-mode identity -----------------------------------------
    # TODO(synk): training-mode dropout would need pltpu.prng_seed /
    # pltpu.prng_random_bits; inference forward is the identity.

    # --- (Embedding . Linear1) fused, then Tanh (hidden lanes padded to 128) --
    h1 = jnp.tanh(
        jnp.dot(hot, fused_ref[...], preferred_element_type=jnp.float32)
        + b1_ref[...])                                 # [tile_n, HID_PAD] f32

    # --- Linear2 (output lanes padded to 128; padded biases are -1e30) -------
    logits = (jnp.dot(h1.astype(jnp.bfloat16), w2_ref[...],
                      preferred_element_type=jnp.float32)
              + b2_ref[...])                           # [tile_n, OUT_PAD] f32

    # --- Stable softmax over the feature axis (padded lanes contribute 0) ----
    m = jnp.max(logits, axis=1, keepdims=True)
    e = jnp.exp(logits - m)
    denom = jnp.sum(e, axis=1, keepdims=True)
    # Exact reciprocal: approx=True (EUP vrcp, ~8-bit) left softmax rows
    # normalized only to ~4e-3 and failed the sum(out)==1 check.
    out_ref[...] = e * pl.reciprocal(denom, approx=False)


def prepare_params(emb_table, w1, b1, w2, b2):
    """One-time parameter preparation (hoisted out of the per-call path).

    Folds Embedding and Linear1 into one fused table
        M[w*V + v, :] = emb[v] @ W1[w*E:(w+1)*E, :]
    zero-pads contraction/lane dims to MXU/lane-friendly sizes and casts the
    MXU weight feeds to bf16 (pads are exactly 0 in bf16).
    """
    hidden = w1.shape[1]
    num_tags = w2.shape[1]

    w1_blocks = w1.reshape(WINDOW, EMBEDDING_SIZE, hidden)
    fused = jnp.einsum("ve,weh->wvh", emb_table, w1_blocks,
                       preferred_element_type=jnp.float32)
    fused = fused.reshape(WINDOW * VOCAB, hidden)
    fused = jnp.pad(fused, ((0, K_PAD - K_FUSED), (0, HID_PAD - hidden)))
    fused = fused.astype(jnp.bfloat16)                             # [512, 128]

    b1_p = jnp.pad(b1.astype(jnp.float32),
                   ((0, 0), (0, HID_PAD - hidden)))                # [1, 128]

    w2_p = jnp.pad(w2, ((0, HID_PAD - hidden), (0, OUT_PAD - num_tags)))
    w2_p = w2_p.astype(jnp.bfloat16)                               # [128, 128]
    b2_p = jnp.pad(b2.astype(jnp.float32),
                   ((0, 0), (0, OUT_PAD - num_tags)),
                   constant_values=NEG_BIG)                        # [1, 128]
    return fused, b1_p, w2_p, b2_p


@functools.partial(jax.jit,
                   static_argnames=("num_tags", "tile_cap", "return_padded"))
def sequence_tagger_forward(idx, fused, b1_p, w2_p, b2_p, *,
                            num_tags=NUM_TAGS, tile_cap=1024,
                            return_padded=False):
    """Forward pass on prepared parameters (see prepare_params)."""
    n = idx.shape[0]

    # Guard against out-of-range indices (would silently collide across the
    # disjoint per-window blocks). Cheap: N x WINDOW int ops.
    idx = jnp.clip(idx.astype(jnp.int32), 0, VOCAB - 1)

    # Tile the batch so the "parallel" axis has >= 2 balanced steps (v7x dual
    # TC; also minimizes padded rows), capped so large batches amortize the
    # ~0.35us per-grid-step overhead with big tiles.
    tile_n = min(tile_cap, max(8, _round_up(pl.cdiv(n, 2), 8)))
    n_pad = _round_up(n, tile_n)

    offs = idx + (jnp.arange(WINDOW, dtype=jnp.int32) * VOCAB)[None, :]
    offs = jnp.pad(offs, ((0, n_pad - n), (0, 0)))

    grid = (n_pad // tile_n,)
    out = pl.pallas_call(
        _tagger_kernel,
        out_shape=jax.ShapeDtypeStruct((n_pad, OUT_PAD), jnp.float32),
        grid_spec=pltpu.PrefetchScalarGridSpec(
            num_scalar_prefetch=0,
            grid=grid,
            in_specs=[
                pl.BlockSpec((tile_n, WINDOW), lambda i: (i, 0)),    # offsets
                pl.BlockSpec((K_PAD, HID_PAD), lambda i: (0, 0)),    # fused tbl
                pl.BlockSpec((1, HID_PAD), lambda i: (0, 0)),        # b1 (pad)
                pl.BlockSpec((HID_PAD, OUT_PAD), lambda i: (0, 0)),  # W2 (pad)
                pl.BlockSpec((1, OUT_PAD), lambda i: (0, 0)),        # b2 (pad)
            ],
            out_specs=pl.BlockSpec((tile_n, OUT_PAD), lambda i: (i, 0)),
        ),
        compiler_params=pltpu.CompilerParams(
            dimension_semantics=("parallel",)),
    )(offs, fused, b1_p, w2_p, b2_p)

    if return_padded:
        # Lane-dense padded block; lets the consumer skip the strided slice.
        return out
    return out[:n, :num_tags]


def _reference(idx, emb_table, w1, b1, w2, b2):
    """Pure-JAX reference mirroring the torch forward."""
    h = emb_table[idx].reshape(idx.shape[0], -1)
    h1 = jnp.tanh(h @ w1 + b1)
    logits = h1 @ w2 + b2
    return jax.nn.softmax(logits, axis=1)


if __name__ == "__main__":
    key = jax.random.PRNGKey(0)
    k_idx, k_emb, k_w1, k_b1, k_w2, k_b2 = jax.random.split(key, 6)

    # Deterministic parameter init (synthetic; not a checkpoint load).
    emb_table = jax.random.normal(k_emb, (VOCAB, EMBEDDING_SIZE), jnp.float32)
    d_in, d_hid, d_out = NETWORK_STRUCTURE
    w1 = jax.random.normal(k_w1, (d_in, d_hid), jnp.float32) * (1.0 / d_in ** 0.5)
    b1 = jax.random.normal(k_b1, (1, d_hid), jnp.float32) * 0.01
    w2 = jax.random.normal(k_w2, (d_hid, d_out), jnp.float32) * (1.0 / d_hid ** 0.5)
    b2 = jax.random.normal(k_b2, (1, d_out), jnp.float32) * 0.01

    # One-time parameter prep (fold + pad + bf16 cast), not per forward call.
    fused, b1_p, w2_p, b2_p = prepare_params(emb_table, w1, b1, w2, b2)

    # Small batch (single tile, grid=1).
    N = 8
    idx = jax.random.randint(k_idx, (N, WINDOW), 0, VOCAB, dtype=jnp.int32)
    out = jax.block_until_ready(
        sequence_tagger_forward(idx, fused, b1_p, w2_p, b2_p))
    ref = _reference(idx, emb_table, w1, b1, w2, b2)
    assert out.shape == (N, NUM_TAGS)
    # Tolerance covers the emb@W1 fold reassociation + bf16 weight feed.
    assert jnp.allclose(out, ref, atol=5e-3, rtol=5e-3), "mismatch vs reference"
    assert jnp.allclose(jnp.sum(out, axis=1), 1.0, atol=1e-3), "softmax rows != 1"

    # Larger, non-multiple batch: exercises padding + balanced 2-step grid.
    N2 = 700
    idx2 = jax.random.randint(k_idx, (N2, WINDOW), 0, VOCAB, dtype=jnp.int32)
    out2 = jax.block_until_ready(
        sequence_tagger_forward(idx2, fused, b1_p, w2_p, b2_p))
    ref2 = _reference(idx2, emb_table, w1, b1, w2, b2)
    assert out2.shape == (N2, NUM_TAGS)
    assert jnp.allclose(out2, ref2, atol=5e-3, rtol=5e-3), "mismatch (tiled) vs reference"
    assert jnp.allclose(jnp.sum(out2, axis=1), 1.0, atol=1e-3), "softmax rows != 1 (tiled)"

    print("KERNEL_OK")
</pallas_src>

<mosaic_0001>
module attributes {stable_mosaic.version = 11 : i64} {
  func.func @_tagger_kernel(%arg0: i32, %arg1: memref<8x5xi32, #tpu.memory_space<vmem>>, %arg2: memref<512x128xbf16, #tpu.memory_space<vmem>>, %arg3: memref<1x128xf32, #tpu.memory_space<vmem>>, %arg4: memref<128x128xbf16, #tpu.memory_space<vmem>>, %arg5: memref<1x128xf32, #tpu.memory_space<vmem>>, %arg6: memref<8x128xf32, #tpu.memory_space<vmem>>) attributes {dimension_semantics = [#tpu.dimension_semantics<parallel>], iteration_bounds = array<i64: 1>, scalar_prefetch = 0 : i64, scratch_operands = 0 : i64, tpu.core_type = #tpu.core_type<tc>, window_params = [{transform_indices = @transform_0, window_bounds = array<i64: 8, 5>}, {pipeline_mode = #tpu.pipeline_mode<synchronous>, transform_indices = @transform_1, window_bounds = array<i64: 512, 128>}, {pipeline_mode = #tpu.pipeline_mode<synchronous>, transform_indices = @transform_2, window_bounds = array<i64: 1, 128>}, {pipeline_mode = #tpu.pipeline_mode<synchronous>, transform_indices = @transform_3, window_bounds = array<i64: 128, 128>}, {pipeline_mode = #tpu.pipeline_mode<synchronous>, transform_indices = @transform_4, window_bounds = array<i64: 1, 128>}, {transform_indices = @transform_5, window_bounds = array<i64: 8, 128>}]} {
    %c0 = arith.constant 0 : index
    %c0_0 = arith.constant 0 : index
    %0 = vector.load %arg1[%c0, %c0_0] : memref<8x5xi32, #tpu.memory_space<vmem>>, vector<8x5xi32>
    %1 = tpu.iota {dimensions = array<i32: 1>} : vector<1x512xi32>
    %2 = vector.extract_strided_slice %0 {offsets = [0, 0], sizes = [8, 1], strides = [1, 1]} : vector<8x5xi32> to vector<8x1xi32>
    %3 = vector.shape_cast %2 : vector<8x1xi32> to vector<8xi32>
    %4 = vector.shape_cast %3 : vector<8xi32> to vector<8x1xi32>
    %5 = vector.broadcast %1 : vector<1x512xi32> to vector<8x512xi32>
    %6 = vector.broadcast %4 : vector<8x1xi32> to vector<8x512xi32>
    %7 = arith.cmpi eq, %5, %6 : vector<8x512xi32>
    %8 = vector.extract_strided_slice %0 {offsets = [0, 1], sizes = [8, 1], strides = [1, 1]} : vector<8x5xi32> to vector<8x1xi32>
    %9 = vector.shape_cast %8 : vector<8x1xi32> to vector<8xi32>
    %10 = vector.shape_cast %9 : vector<8xi32> to vector<8x1xi32>
    %11 = vector.broadcast %1 : vector<1x512xi32> to vector<8x512xi32>
    %12 = vector.broadcast %10 : vector<8x1xi32> to vector<8x512xi32>
    %13 = arith.cmpi eq, %11, %12 : vector<8x512xi32>
    %14 = arith.ori %7, %13 : vector<8x512xi1>
    %15 = vector.extract_strided_slice %0 {offsets = [0, 2], sizes = [8, 1], strides = [1, 1]} : vector<8x5xi32> to vector<8x1xi32>
    %16 = vector.shape_cast %15 : vector<8x1xi32> to vector<8xi32>
    %17 = vector.shape_cast %16 : vector<8xi32> to vector<8x1xi32>
    %18 = vector.broadcast %1 : vector<1x512xi32> to vector<8x512xi32>
    %19 = vector.broadcast %17 : vector<8x1xi32> to vector<8x512xi32>
    %20 = arith.cmpi eq, %18, %19 : vector<8x512xi32>
    %21 = arith.ori %14, %20 : vector<8x512xi1>
    %22 = vector.extract_strided_slice %0 {offsets = [0, 3], sizes = [8, 1], strides = [1, 1]} : vector<8x5xi32> to vector<8x1xi32>
    %23 = vector.shape_cast %22 : vector<8x1xi32> to vector<8xi32>
    %24 = vector.shape_cast %23 : vector<8xi32> to vector<8x1xi32>
    %25 = vector.broadcast %1 : vector<1x512xi32> to vector<8x512xi32>
    %26 = vector.broadcast %24 : vector<8x1xi32> to vector<8x512xi32>
    %27 = arith.cmpi eq, %25, %26 : vector<8x512xi32>
    %28 = arith.ori %21, %27 : vector<8x512xi1>
    %29 = vector.extract_strided_slice %0 {offsets = [0, 4], sizes = [8, 1], strides = [1, 1]} : vector<8x5xi32> to vector<8x1xi32>
    %30 = vector.shape_cast %29 : vector<8x1xi32> to vector<8xi32>
    %31 = vector.shape_cast %30 : vector<8xi32> to vector<8x1xi32>
    %32 = vector.broadcast %1 : vector<1x512xi32> to vector<8x512xi32>
    %33 = vector.broadcast %31 : vector<8x1xi32> to vector<8x512xi32>
    %34 = arith.cmpi eq, %32, %33 : vector<8x512xi32>
    %35 = arith.ori %28, %34 : vector<8x512xi1>
    %36 = arith.extui %35 : vector<8x512xi1> to vector<8x512xi32>
    %37 = arith.sitofp %36 : vector<8x512xi32> to vector<8x512xf32>
    %38 = arith.truncf %37 : vector<8x512xf32> to vector<8x512xbf16>
    %c0_1 = arith.constant 0 : index
    %c0_2 = arith.constant 0 : index
    %39 = vector.load %arg2[%c0_1, %c0_2] : memref<512x128xbf16, #tpu.memory_space<vmem>>, vector<512x128xbf16>
    %cst = arith.constant dense<0.000000e+00> : vector<8x128xf32>
    %40 = tpu.matmul %38, %39, %cst {dimension_numbers = #tpu.dot_dimension_numbers<[1], [0], [0], [1], [0, 0, 1, 1], [], []>} : vector<8x512xbf16>, vector<512x128xbf16>, vector<8x128xf32> -> vector<8x128xf32>
    %c0_3 = arith.constant 0 : index
    %c0_4 = arith.constant 0 : index
    %41 = vector.load %arg3[%c0_3, %c0_4] : memref<1x128xf32, #tpu.memory_space<vmem>>, vector<1x128xf32>
    %42 = vector.broadcast %41 : vector<1x128xf32> to vector<8x128xf32>
    %43 = arith.addf %40, %42 : vector<8x128xf32>
    %44 = math.tanh %43 : vector<8x128xf32>
    %45 = arith.truncf %44 : vector<8x128xf32> to vector<8x128xbf16>
    %c0_5 = arith.constant 0 : index
    %c0_6 = arith.constant 0 : index
    %46 = vector.load %arg4[%c0_5, %c0_6] : memref<128x128xbf16, #tpu.memory_space<vmem>>, vector<128x128xbf16>
    %cst_7 = arith.constant dense<0.000000e+00> : vector<8x128xf32>
    %47 = tpu.matmul %45, %46, %cst_7 {dimension_numbers = #tpu.dot_dimension_numbers<[1], [0], [0], [1], [0, 0, 1, 1], [], []>} : vector<8x128xbf16>, vector<128x128xbf16>, vector<8x128xf32> -> vector<8x128xf32>
    %c0_8 = arith.constant 0 : index
    %c0_9 = arith.constant 0 : index
    %48 = vector.load %arg5[%c0_8, %c0_9] : memref<1x128xf32, #tpu.memory_space<vmem>>, vector<1x128xf32>
    %49 = vector.broadcast %48 : vector<1x128xf32> to vector<8x128xf32>
    %50 = arith.addf %47, %49 : vector<8x128xf32>
    %cst_10 = arith.constant dense<0xFF800000> : vector<8xf32>
    %51 = vector.multi_reduction <maximumf>, %50, %cst_10 [1] : vector<8x128xf32> to vector<8xf32>
    %52 = vector.shape_cast %51 : vector<8xf32> to vector<8x1xf32>
    %53 = vector.broadcast %52 : vector<8x1xf32> to vector<8x128xf32>
    %54 = arith.subf %50, %53 : vector<8x128xf32>
    %55 = math.exp %54 : vector<8x128xf32>
    %cst_11 = arith.constant dense<0.000000e+00> : vector<8xf32>
    %56 = vector.multi_reduction <add>, %55, %cst_11 [1] : vector<8x128xf32> to vector<8xf32>
    %57 = vector.shape_cast %56 : vector<8xf32> to vector<8x1xf32>
    %58 = tpu.reciprocal %57 : vector<8x1xf32> -> vector<8x1xf32>
    %59 = vector.broadcast %58 : vector<8x1xf32> to vector<8x128xf32>
    %60 = arith.mulf %55, %59 : vector<8x128xf32>
    %c0_12 = arith.constant 0 : index
    %c0_13 = arith.constant 0 : index
    %61 = vector.load %arg6[%c0_12, %c0_13] : memref<8x128xf32, #tpu.memory_space<vmem>>, vector<8x128xf32>
    tpu.vector_store %arg6[%c0_12, %c0_13], %60 {strides = array<i32>} : memref<8x128xf32, #tpu.memory_space<vmem>>, vector<8x128xf32>,
    return
  }
  func.func @transform_0(%arg0: i32) -> (i32, i32) {
    %c0_i32 = arith.constant 0 : i32
    %c0_i32_0 = arith.constant 0 : i32
    return %arg0, %c0_i32 : i32, i32
  }
  func.func @transform_1(%arg0: i32) -> (i32, i32) {
    %c0_i32 = arith.constant 0 : i32
    %c0_i32_0 = arith.constant 0 : i32
    %c0_i32_1 = arith.constant 0 : i32
    return %c0_i32, %c0_i32_0 : i32, i32
  }
  func.func @transform_2(%arg0: i32) -> (i32, i32) {
    %c0_i32 = arith.constant 0 : i32
    %c0_i32_0 = arith.constant 0 : i32
    %c0_i32_1 = arith.constant 0 : i32
    return %c0_i32, %c0_i32_0 : i32, i32
  }
  func.func @transform_3(%arg0: i32) -> (i32, i32) {
    %c0_i32 = arith.constant 0 : i32
    %c0_i32_0 = arith.constant 0 : i32
    %c0_i32_1 = arith.constant 0 : i32
    return %c0_i32, %c0_i32_0 : i32, i32
  }
  func.func @transform_4(%arg0: i32) -> (i32, i32) {
    %c0_i32 = arith.constant 0 : i32
    %c0_i32_0 = arith.constant 0 : i32
    %c0_i32_1 = arith.constant 0 : i32
    return %c0_i32, %c0_i32_0 : i32, i32
  }
  func.func @transform_5(%arg0: i32) -> (i32, i32) {
    %c0_i32 = arith.constant 0 : i32
    %c0_i32_0 = arith.constant 0 : i32
    return %arg0, %c0_i32 : i32, i32
  }
}

</mosaic_0001>

<bundles_post_ra>
// kernel: sequence_tagger_forward.1
= control target key start
LH: loop header
LB: loop body
LE: loop exit
PB: predicated region body
PF: predicated region fallthrough
CT: control target
= control target key end

     0   :  { %10 = vsyncpa [#allocation3], 0  ;;  %s942_s0 = inlined_call_operand.vmem [shape: s32[8,5], index: 0, kind: input, shape index: {}]   ;;  %s943_s1 = inlined_call_operand.hbm [shape: bf16[512,128], index: 1, kind: input, shape index: {}]   ;;  %s944_s2 = inlined_call_operand.vmem [shape: f32[1,128], index: 2, kind: input, shape index: {}]   ;;  %s945_s3 = inlined_call_operand.hbm [shape: bf16[128,128], index: 3, kind: input, shape index: {}]   ;;  %s946_s4 = inlined_call_operand.vmem [shape: f32[1,128], index: 4, kind: input, shape index: {}]   ;;  %s947_s5 = inlined_call_operand.hbm [shape: f32[8,128], index: 5, kind: output, shape index: {}]  }
   0x1   :  { %11 = vsyncpa [#allocation6], 0 }
   0x2   :  { %12 = vsyncpa [#allocation4], 0  ;;  %s19_s20 = sshll.u32 %s943_s1, 4  ;;  %s865_s21 = smov [#allocation2]   ;;  %s20_s20 = int_to_ptr.hbm [resolvable:$true] %s19_s20 }
   0x3   :  { %s21_s22 = sshll.u32 %s865_s21, 4  ;;  %s34_s25 = sshll.u32 %s945_s3, 4  ;;  %s22_s22 = int_to_ptr.vmem [resolvable:$true] %s21_s22  ;;  %s35_s25 = int_to_ptr.hbm [resolvable:$true] %s34_s25 }
   0x4   :  { %s866_s26 = smov 64   ;;  %s867_s27 = smov 4  }
   0x5   :  { %27 = dma.hbm_to_vmem [thread:$0]  %s20_s20, 4096, %s22_s22, [#allocation3], %s866_s26, %s866_s26, %s867_s27  }
   0x6   :  { %s868_s28 = smov [#allocation5]  }
   0x7   :  { %s36_s29 = sshll.u32 %s868_s28, 4  ;;  %s37_s29 = int_to_ptr.vmem [resolvable:$true] %s36_s29 }
   0x8   :  { %42 = dma.hbm_to_vmem [thread:$0]  %s35_s25, 1024, %s37_s29, [#allocation6], %s866_s26, %s866_s26, %s867_s27  }
   0x9   :  { %859 = dma.done.wait [#allocation3], 4096  }
   0xa   :  { %860 = vsyncadd [#allocation3], 4294963200 }
   0xb   :  { %861 = dma.done.wait [#allocation6], 1024  }
   0xc   :  { %862 = vsyncadd [#allocation6], 4294966272  ;;  %v869_v0 = vmov 0   ;;  %v870_v1 = vmov 2   ;;  %v871_v2 = vmov 4   ;;  %v53_v3 = vld [vmem:[%s942_s0] sm:$0xff]  ;;  %v54_v39 = vlaneseq }
   0xd   :  { %773 = vset.pattern.permute.xlu0 %v869_v0  ;;  %775 = vset.pattern.permute.xlu1 %v870_v1  ;;  %v729_v4 = vld [vmem:[#allocation2 + $0x38] sm:$0xff]  ;;  %v728_v8 = vld [vmem:[#allocation2 + $0x30] sm:$0xff]  ;;  %v727_v12 = vld [vmem:[#allocation2 + $0x28] sm:$0xff]  ;;  %v872_v16 = vmov 1   ;;  %v873_v17 = vmov 3   ;;  %v948_v51 = vmov 0 }
   0xe   :  { %777 = vset.pattern.permute.xlu2 %v871_v2  ;;  %v737_v5 = vld [vmem:[#allocation2 + $0x78] sm:$0xff]  ;;  %60 = vperm.xlu0 %773, %v53_v3   ;;  %v736_v9 = vld [vmem:[#allocation2 + $0x70] sm:$0xff]  ;;  %v735_v13 = vld [vmem:[#allocation2 + $0x68] sm:$0xff]  ;;  %v55_v43 = vand.u32 127, %v54_v39  ;;  %v950_v52 = vmov 0  ;;  %v952_v53 = vmov 0 }
   0xf   :  { %78 = vperm.xlu1 %775, %v53_v3   ;;  %v745_v6 = vld [vmem:[#allocation2 + $0xb8] sm:$0xff]  ;;  %100 = vperm.xlu2 %777, %v53_v3   ;;  %v744_v10 = vld [vmem:[#allocation2 + $0xb0] sm:$0xff]  ;;  %v743_v14 = vld [vmem:[#allocation2 + $0xa8] sm:$0xff]  ;;  %v874_v54 = vmov 0.0   ;;  %s547_s10 = sshll.u32 %s947_s5, 4  ;;  %s548_s10 = int_to_ptr.hbm [resolvable:$true] %s547_s10 }
  0x10   :  { %v753_v7 = vld [vmem:[#allocation2 + $0xf8] sm:$0xff]  ;;  %382 = vmatpush.bf16.msra.mxu0 %v729_v4  ;;  %395 = vmatpush.bf16.msra.mxu1 %v737_v5  ;;  %v752_v11 = vld [vmem:[#allocation2 + $0xf0] sm:$0xff]  ;;  %v751_v15 = vld [vmem:[#allocation2 + $0xe8] sm:$0xff]  ;;  %v56_v45 = vadd.s32 128, %v55_v43  ;;  %v57_v46 = vadd.s32 256, %v55_v43  ;;  %v58_v47 = vadd.s32 384, %v55_v43 }
  0x11   :  { %408 = vmatpush.bf16.msra.mxu2 %v745_v6  ;;  %421 = vmatpush.bf16.msra.mxu3 %v753_v7  ;;  %v726_v18 = vld [vmem:[#allocation2 + $0x20] sm:$0xff]  ;;  %v725_v22 = vld [vmem:[#allocation2 + $0x18] sm:$0xff]  ;;  %v724_v26 = vld [vmem:[#allocation2 + $0x10] sm:$0xff] }
  0x12   :  { %v734_v19 = vld [vmem:[#allocation2 + $0x60] sm:$0xff]  ;;  %v733_v23 = vld [vmem:[#allocation2 + $0x58] sm:$0xff]  ;;  %v732_v27 = vld [vmem:[#allocation2 + $0x50] sm:$0xff] }
  0x13   :  { %v742_v20 = vld [vmem:[#allocation2 + $0xa0] sm:$0xff]  ;;  %v741_v24 = vld [vmem:[#allocation2 + $0x98] sm:$0xff]  ;;  %v740_v28 = vld [vmem:[#allocation2 + $0x90] sm:$0xff] }
  0x14   :  { %383 = vmatpush.bf16.msra.mxu0 %v728_v8  ;;  %396 = vmatpush.bf16.msra.mxu1 %v736_v9  ;;  %v750_v21 = vld [vmem:[#allocation2 + $0xe0] sm:$0xff]  ;;  %v749_v25 = vld [vmem:[#allocation2 + $0xd8] sm:$0xff]  ;;  %v748_v29 = vld [vmem:[#allocation2 + $0xd0] sm:$0xff] }
  0x15   :  { %409 = vmatpush.bf16.msra.mxu2 %v744_v10  ;;  %422 = vmatpush.bf16.msra.mxu3 %v752_v11  ;;  %v723_v30 = vld [vmem:[#allocation2 + $0x8] sm:$0xff]  ;;  %v722_v34 = vld [vmem:[#allocation2] sm:$0xff]  ;;  %v761_v38 = vld [vmem:[#allocation5 + $0x38] sm:$0xff] }
  0x16   :  { %774 = vset.pattern.permute.xlu0 %v872_v16  ;;  %v731_v31 = vld [vmem:[#allocation2 + $0x48] sm:$0xff]  ;;  %v730_v35 = vld [vmem:[#allocation2 + $0x40] sm:$0xff]  ;;  %v760_v42 = vld [vmem:[#allocation5 + $0x30] sm:$0xff] }
  0x17   :  { %776 = vset.pattern.permute.xlu1 %v873_v17  ;;  %67 = vperm.xlu0 %774, %v53_v3   ;;  %v739_v32 = vld [vmem:[#allocation2 + $0x88] sm:$0xff]  ;;  %v738_v36 = vld [vmem:[#allocation2 + $0x80] sm:$0xff]  ;;  %v757_v0 = vld [vmem:[#allocation5 + $0x18] sm:$0xff] }
  0x18   :  { %89 = vperm.xlu1 %776, %v53_v3   ;;  %384 = vmatpush.bf16.msra.mxu0 %v727_v12  ;;  %v747_v33 = vld [vmem:[#allocation2 + $0xc8] sm:$0xff]  ;;  %v746_v37 = vld [vmem:[#allocation2 + $0xc0] sm:$0xff]  ;;  %v756_v1 = vld [vmem:[#allocation5 + $0x10] sm:$0xff] }
  0x19   :  { %397 = vmatpush.bf16.msra.mxu1 %v735_v13  ;;  %410 = vmatpush.bf16.msra.mxu2 %v743_v14  ;;  %v759_v44 = vld [vmem:[#allocation5 + $0x28] sm:$0xff]  ;;  %v758_v63 = vld [vmem:[#allocation5 + $0x20] sm:$0xff] }
  0x1a   :  { %423 = vmatpush.bf16.msra.mxu3 %v751_v15  ;;  %v754_v3 = vld [vmem:[#allocation5] sm:$0xff] }
  0x1b   :  { %v779_v5 = vld [vmem:[%s944_s2] ss:$0 sm:$0xff]  ;;  %s875_s2 = smov [#allocation7]  }
  0x1c   :  { %385 = vmatpush.bf16.msra.mxu0 %v726_v18 }
  0x1d   :  { %398 = vmatpush.bf16.msra.mxu1 %v734_v19  ;;  %411 = vmatpush.bf16.msra.mxu2 %v742_v20  ;;  %v780_v19 = vld [vmem:[%s946_s4] ss:$0 sm:$0xff]  ;;  %s545_s4 = sshll.u32 %s875_s2, 4  ;;  %s546_s4 = int_to_ptr.vmem [resolvable:$true] %s545_s4 }
  0x1e   :  { %424 = vmatpush.bf16.msra.mxu3 %v750_v21 }
  0x1f   :  { %778 = vset.pattern.permute.xlu0 %v871_v2  ;;  %v755_v2 = vld [vmem:[#allocation5 + $0x8] sm:$0xff] }
  0x20   :  { %386 = vmatpush.bf16.msra.mxu0 %v725_v22 }
  0x21   :  { %399 = vmatpush.bf16.msra.mxu1 %v733_v23  ;;  %412 = vmatpush.bf16.msra.mxu2 %v741_v24 }
  0x22   :  { %425 = vmatpush.bf16.msra.mxu3 %v749_v25 }
  0x24   :  { %387 = vmatpush.bf16.msra.mxu0 %v724_v26 }
  0x25   :  { %400 = vmatpush.bf16.msra.mxu1 %v732_v27  ;;  %413 = vmatpush.bf16.msra.mxu2 %v740_v28 }
  0x26   :  { %426 = vmatpush.bf16.msra.mxu3 %v748_v29 }
  0x28   :  { %388 = vmatpush.bf16.msra.mxu0 %v723_v30 }
  0x29   :  { %401 = vmatpush.bf16.msra.mxu1 %v731_v31  ;;  %414 = vmatpush.bf16.msra.mxu2 %v739_v32 }
  0x2a   :  { %427 = vmatpush.bf16.msra.mxu3 %v747_v33 }
  0x2c   :  { %389 = vmatpush.bf16.msra.mxu0 %v722_v34 }
  0x2d   :  { %402 = vmatpush.bf16.msra.mxu1 %v730_v35  ;;  %415 = vmatpush.bf16.msra.mxu2 %v738_v36 }
  0x2e   :  { %428 = vmatpush.bf16.msra.mxu3 %v746_v37 }
  0x30   :  { %504 = vmatpush.bf16.msrb.mxu0 %v761_v38 }
  0x34   :  { %505 = vmatpush.bf16.msrb.mxu0 %v760_v42 }
  0x38   :  { %506 = vmatpush.bf16.msrb.mxu0 %v759_v44 }
  0x3c   :  { %507 = vmatpush.bf16.msrb.mxu0 %v758_v63 }
  0x40   :  { %508 = vmatpush.bf16.msrb.mxu0 %v757_v0 }
  0x44   :  { %509 = vmatpush.bf16.msrb.mxu0 %v756_v1 }
  0x48   :  { %510 = vmatpush.bf16.msrb.mxu0 %v755_v2 }
  0x4c   :  { %511 = vmatpush.bf16.msrb.mxu0 %v754_v3 }
  0x69   :  { %v101_v50 = vpop.permute.xlu2 %100 }
  0x6a   :  { %vm102_vm14 = vcmp.eq.s32.totalorder %v55_v43, %v101_v50 }
  0x80   :  { %v61_v40 = vpop.permute.xlu0 %60 }
  0x81   :  { %v79_v41 = vpop.permute.xlu1 %78  ;;  %vm62_vm0 = vcmp.eq.s32.totalorder %v55_v43, %v61_v40  ;;  %vm63_vm4 = vcmp.eq.s32.totalorder %v56_v45, %v61_v40  ;;  %vm64_vm7 = vcmp.eq.s32.totalorder %v57_v46, %v61_v40  ;;  %vm65_vm9 = vcmp.eq.s32.totalorder %v58_v47, %v61_v40 }
  0x82   :  { %vm80_vm13 = vcmp.eq.s32.totalorder %v55_v43, %v79_v41 }
  0x89   :  { %v68_v48 = vpop.permute.xlu0 %67 }
  0x8a   :  { %vm69_vm1 = vcmp.eq.s32.totalorder %v55_v43, %v68_v48  ;;  %vm70_vm2 = vcmp.eq.s32.totalorder %v56_v45, %v68_v48  ;;  %vm71_vm3 = vcmp.eq.s32.totalorder %v57_v46, %v68_v48  ;;  %v90_v49 = vpop.permute.xlu1 %89  ;;  %vm72_vm5 = vcmp.eq.s32.totalorder %v58_v47, %v68_v48 }
  0x8b   :  { %vm73_vm6 = vmor %vm62_vm0, %vm69_vm1  ;;  %vm91_vm11 = vcmp.eq.s32.totalorder %v55_v43, %v90_v49  ;;  %vm92_vm1 = vcmp.eq.s32.totalorder %v56_v45, %v90_v49 }
  0x8c   :  { %vm915_vm8 = vmor %vm63_vm4, %vm70_vm2  ;;  %vm81_vm4 = vcmp.eq.s32.totalorder %v56_v45, %v79_v41 }
  0x8d   :  { %v949_v51 = vsel %vm915_vm8, 4294967295, %v948_v51  ;;  %vm919_vm10 = vmor %vm64_vm7, %vm71_vm3  ;;  %vm103_vm8 = vcmp.eq.s32.totalorder %v56_v45, %v101_v50 }
  0x8e   :  { %v951_v52 = vsel %vm919_vm10, 4294967295, %v950_v52  ;;  %vm923_vm12 = vmor %vm65_vm9, %vm72_vm5  ;;  %vm954_vm3 = vnez %v949_v51  ;;  %vm93_vm5 = vcmp.eq.s32.totalorder %v57_v46, %v90_v49 }
  0x8f   :  { %v953_v53 = vsel %vm923_vm12, 4294967295, %v952_v53  ;;  %vm84_vm15 = vmor %vm73_vm6, %vm80_vm13  ;;  %vm82_vm12 = vcmp.eq.s32.totalorder %v57_v46, %v79_v41  ;;  %vm104_vm6 = vcmp.eq.s32.totalorder %v57_v46, %v101_v50  ;;  %vm955_vm13 = vnez %v951_v52 }
  0x90   :  { %vm95_vm0 = vmor %vm84_vm15, %vm91_vm11  ;;  %vm94_vm15 = vcmp.eq.s32.totalorder %v58_v47, %v90_v49 }
  0x91   :  { %vm106_vm2 = vmor %vm95_vm0, %vm102_vm14 }
  0x92   :  { %v558_v55 = vsel %vm106_vm2, 1.0, %v874_v54  ;;  %vm85_vm7 = vmor %vm954_vm3, %vm81_vm4  ;;  %vm83_vm2 = vcmp.eq.s32.totalorder %v58_v47, %v79_v41  ;;  %vm105_vm3 = vcmp.eq.s32.totalorder %v58_v47, %v101_v50  ;;  %vm956_vm4 = vnez %v953_v53 }
  0x93   :  { %v118_v56 = vpack.c.bf16 %v558_v55, %v558_v55  ;;  %vm96_vm10 = vmor %vm85_vm7, %vm92_vm1 }
  0x94   :  { %vm107_vm9 = vmor %vm96_vm10, %vm103_vm8 }
  0x95   :  { %390 = vmatmul.bf16.vlgmr.msra.gmra.mxu0 %v118_v56  ;;  %v559_v57 = vsel %vm107_vm9, 1.0, %v874_v54  ;;  %vm86_vm11 = vmor %vm955_vm13, %vm82_vm12 }
  0x96   :  { %v119_v58 = vpack.c.bf16 %v559_v57, %v559_v57  ;;  %vm97_vm14 = vmor %vm86_vm11, %vm93_vm5 }
  0x97   :  { %vm108_vm0 = vmor %vm97_vm14, %vm104_vm6 }
  0x98   :  { %403 = vmatmul.bf16.vlgmr.msra.gmra.mxu1 %v119_v58  ;;  %v560_v59 = vsel %vm108_vm0, 1.0, %v874_v54  ;;  %vm87_vm1 = vmor %vm956_vm4, %vm83_vm2 }
  0x99   :  { %v120_v60 = vpack.c.bf16 %v560_v59, %v560_v59  ;;  %vm98_vm8 = vmor %vm87_vm1, %vm94_vm15 }
  0x9a   :  { %vm109_vm10 = vmor %vm98_vm8, %vm105_vm3 }
  0x9b   :  { %416 = vmatmul.bf16.vlgmr.msra.gmra.mxu2 %v120_v60  ;;  %v561_v61 = vsel %vm109_vm10, 1.0, %v874_v54 }
  0x9c   :  { %v121_v62 = vpack.c.bf16 %v561_v61, %v561_v61 }
  0x9e   :  { %429 = vmatmul.bf16.vlgmr.msra.gmra.mxu3 %v121_v62 }
 0x112   :  { %v391_v4 = vpop.f32.mrf.mxu0 }
 0x113   :  { %v392_v7 = vadd.f32 %v779_v5, %v391_v4 }
 0x115   :  { %v404_v6 = vpop.f32.mrf.mxu1 }
 0x116   :  { %v405_v9 = vadd.f32 %v404_v6, %v392_v7 }
 0x11a   :  { %v393_v8 = vpop.f32.mrf.mxu0 }
 0x11d   :  { %v406_v10 = vpop.f32.mrf.mxu1 }
 0x11e   :  { %v417_v11 = vpop.f32.mrf.mxu2 }
 0x11f   :  { %v418_v12 = vadd.f32 %v417_v11, %v405_v9 }
 0x121   :  { %v430_v13 = vpop.f32.mrf.mxu3 }
 0x122   :  { %v431_v14 = vadd.f32 %v430_v13, %v418_v12 }
 0x124   :  { %781 = vtanh.f32 %v431_v14 }
 0x126   :  { %v419_v15 = vpop.f32.mrf.mxu2 }
 0x129   :  { %v432_v16 = vpop.f32.mrf.mxu3 }
 0x12a   :  { %v782_v17 = vpop.eup %781 }
 0x12b   :  { %v435_v18 = vpack.c.bf16 %v782_v17, %v782_v17 }
 0x12d   :  { %512 = vmatmul.bf16.vlgmr.msrb.gmra.mxu0 %v435_v18 }
 0x1aa   :  { %v513_v20 = vpop.f32.mrf.mxu0 }
 0x1ab   :  { %v514_v21 = vadd.f32 %v780_v19, %v513_v20 }
 0x1ad   :  { %517 = vmax.xlane.f32.xlu2 %v514_v21 }
 0x1b2   :  { %v515_v22 = vpop.f32.mrf.mxu0 }
 0x220   :  { %v518_v23 = vpop.xlane.xlu2 %517 }
 0x221   :  { %v519_v24 = vsub.f32 %v514_v21, %v518_v23 }
 0x223   :  { %v520_v25 = vmul.f32 1.442695, %v519_v24 }
 0x225   :  { %783 = vpow2.f32 %v520_v25 }
 0x22b   :  { %v784_v26 = vpop.eup %783 }
 0x22c   :  { %522 = vadd.xlane.f32.xlu1 %v784_v26 }
 0x29f   :  { %v523_v27 = vpop.xlane.xlu1 %522 }
 0x2a0   :  { %785 = vrcp.f32 %v523_v27  ;;  %v535_v31 = vand.u32 2147483648, %v523_v27  ;;  %v533_v33 = vand.u32 2147483647, %v523_v27  ;;  %vm529_vm7 = vweird.f32 %v523_v27 }
 0x2a2   :  { %v536_v35 = vor.u32 1.1754944e-38, %v535_v31  ;;  %vm534_vm9 = vcmp.eq.f32.partialorder %v533_v33, 8.507059e+37 }
 0x2a6   :  { %v786_v28 = vpop.eup %785 }
 0x2a7   :  { %v525_v29 = vmul.f32 %v786_v28, %v523_v27  ;;  %vm530_vm12 = vweird.f32 %v786_v28 }
 0x2a8   :  { %vm531_vm5 = vmor %vm529_vm7, %vm530_vm12 }
 0x2a9   :  { %v526_v30 = vsub.f32 1.0, %v525_v29 }
 0x2ab   :  { %v527_v32 = vmul.f32 %v786_v28, %v526_v30 }
 0x2ad   :  { %v528_v34 = vadd.f32 %v786_v28, %v527_v32 }
 0x2af   :  { %v532_v36 = vsel %vm531_vm5, %v786_v28, %v528_v34 }
 0x2b0   :  { %v537_v37 = vsel %vm534_vm9, %v536_v35, %v532_v36 }
 0x2b1   :  { %v538_v38 = vmul.f32 %v784_v26, %v537_v37 }
 0x2b3   :  { %539 = vst [vmem:[#allocation7] sm:$0xff] %v538_v38 }
 0x2b4   :  { %550 = dma.vmem_to_hbm [thread:$0]  %s546_s4, 128, %s548_s10, [#allocation4]  }
 0x2b5   :  { %863 = dma.done.wait [#allocation4], 128  }
 0x2b6   :  { %864 = vsyncadd [#allocation4], 4294967168 }
 0x2b7   :  { %555 = vsyncpa [#allocation3], 1 }
 0x2b8   :  { %556 = vsyncpa [#allocation6], 1 }
 0x2b9   :  { %557 = vsyncpa [#allocation4], 1 }

</bundles_post_ra>
